<compile_context>
chip_gen: v7x
topology: tpu7x:2x2x1
jax: 0.10.0
libtpu: 0.0.40
codegen_flags: <defaults>
</compile_context>

<pallas_src>
import math
import jax
import jax.numpy as jnp
from jax.experimental import pallas as pl
from jax.experimental.pallas import tpu as pltpu

_INV_SQRT2 = 1.0 / math.sqrt(2.0)


def _gelu_exact(h):
    # Exact (erf) GELU — PyTorch nn.GELU() default semantics.
    return 0.5 * h * (1.0 + jax.lax.erf(h * _INV_SQRT2))


def _mlp_resident_kernel(x_ref, w1_ref, b1_ref, w2_ref, b2_ref, o_ref):
    """Weights fully VMEM-resident: one fused matmul->gelu->matmul per row tile."""
    x = x_ref[...]                                                   # (tm, D)
    h = jnp.dot(x, w1_ref[...], preferred_element_type=jnp.float32) + b1_ref[...]
    h = _gelu_exact(h)
    y = jnp.dot(h.astype(x.dtype), w2_ref[...], preferred_element_type=jnp.float32)
    o_ref[...] = (y + b2_ref[...]).astype(o_ref.dtype)
    # TODO(synk): training-mode dropout (stateful PRNG masking) omitted; eval-mode identity.


def _mlp_streaming_kernel(x_ref, w1_ref, b1_ref, w2_ref, b2_ref, o_ref, acc_ref):
    """Fallback for weights too large for VMEM: H streamed as the reduction axis."""
    k = pl.program_id(1)

    x = x_ref[...]                                                   # (tm, D)
    h = jnp.dot(x, w1_ref[...], preferred_element_type=jnp.float32) + b1_ref[...]
    h = _gelu_exact(h)
    part = jnp.dot(h.astype(x.dtype), w2_ref[...], preferred_element_type=jnp.float32)

    @pl.when(k == 0)
    def _():
        acc_ref[...] = part          # direct store: saves a zero-init read+write

    @pl.when(k > 0)
    def _():
        acc_ref[...] += part

    @pl.when(k == pl.num_programs(1) - 1)
    def _():
        o_ref[...] = (acc_ref[...] + b2_ref[...]).astype(o_ref.dtype)
    # TODO(synk): training-mode dropout (stateful PRNG masking) omitted; eval-mode identity.


def mlp_forward(x, w1, b1, w2, b2, *, tm=None, th=512, vmem_budget_bytes=None):
    """x: (B, S, D). w1: (D, 4D), b1: (4D,), w2: (4D, D), b2: (D,)."""
    B, S, D = x.shape
    H = w1.shape[1]
    M = B * S

    it_x = jnp.dtype(x.dtype).itemsize
    it_w = jnp.dtype(w1.dtype).itemsize
    weight_bytes = ((w1.size + w2.size) * it_w
                    + (b1.size + b2.size) * jnp.dtype(b1.dtype).itemsize)

    # Generation-aware VMEM capacity (v5e/v6e: 128 MiB, v7x: 64 MiB per TensorCore).
    try:
        cap = int(getattr(pltpu.get_tpu_info(), "vmem_capacity_bytes", 64 << 20))
    except Exception:
        cap = 64 << 20
    if vmem_budget_bytes is None:
        vmem_budget_bytes = (cap * 7) // 8          # leave headroom for compiler scratch
    vmem_limit = int(min((cap * 7) // 8, 112 << 20))

    x2 = x.reshape(M, D)
    b1_2 = b1.reshape(1, H)
    b2_2 = b2.reshape(1, D)

    def _resident_need(tm_):
        # Conservative: weights counted double-buffered even though the constant
        # index_map means they are DMA'd only once per call.
        return (2 * weight_bytes
                + 4 * tm_ * D * it_x        # x + out tiles, double-buffered
                + tm_ * H * 4               # f32 gelu intermediate
                + (2 << 20))                # slop

    # Pick the largest row tile whose resident footprint fits the VMEM budget.
    tm_candidates = [tm] if tm is not None else [512, 256, 128]
    tm_eff = None
    for cand in tm_candidates:
        cand = min(cand, M)                 # full-dim block is always layout-legal
        if _resident_need(cand) <= vmem_budget_bytes:
            tm_eff = cand
            break
    resident = tm_eff is not None

    if resident:
        num_row_tiles = pl.cdiv(M, tm_eff)
        cost = pl.CostEstimate(
            flops=4 * M * D * H,                         # two matmuls
            transcendentals=M * H,                       # one erf per hidden element
            bytes_accessed=2 * M * D * it_x + weight_bytes,
        )
        grid_spec = pltpu.PrefetchScalarGridSpec(
            num_scalar_prefetch=0,
            grid=(num_row_tiles,),
            in_specs=[
                pl.BlockSpec((tm_eff, D), lambda i: (i, 0)),   # x rows
                pl.BlockSpec((D, H),      lambda i: (0, 0)),   # c_fc weight  (resident)
                pl.BlockSpec((1, H),      lambda i: (0, 0)),   # c_fc bias    (resident)
                pl.BlockSpec((H, D),      lambda i: (0, 0)),   # c_proj weight(resident)
                pl.BlockSpec((1, D),      lambda i: (0, 0)),   # c_proj bias  (resident)
            ],
            out_specs=pl.BlockSpec((tm_eff, D), lambda i: (i, 0)),
        )
        kernel = _mlp_resident_kernel
        semantics = ("parallel",)
    else:
        tm_eff = min(256, M)
        # Largest divisor of H that is a multiple of 128 and <= th (lane-legal chunk).
        th_eff = H
        start = (min(th, H) // 128) * 128
        for cand in range(start, 0, -128):
            if H % cand == 0:
                th_eff = cand
                break
        num_row_tiles = pl.cdiv(M, tm_eff)
        cost = pl.CostEstimate(
            flops=4 * M * D * H,
            transcendentals=M * H,
            bytes_accessed=2 * M * D * it_x + weight_bytes * num_row_tiles,
        )
        grid_spec = pltpu.PrefetchScalarGridSpec(
            num_scalar_prefetch=0,
            grid=(num_row_tiles, H // th_eff),
            in_specs=[
                pl.BlockSpec((tm_eff, D), lambda i, k: (i, 0)),     # x rows (held across k)
                pl.BlockSpec((D, th_eff), lambda i, k: (0, k),
                             pipeline_mode=pl.Buffered(3)),         # c_fc weight chunk
                pl.BlockSpec((1, th_eff), lambda i, k: (0, k)),     # c_fc bias chunk
                pl.BlockSpec((th_eff, D), lambda i, k: (k, 0),
                             pipeline_mode=pl.Buffered(3)),         # c_proj weight chunk
                pl.BlockSpec((1, D),      lambda i, k: (0, 0)),     # c_proj bias
            ],
            out_specs=pl.BlockSpec((tm_eff, D), lambda i, k: (i, 0)),
            scratch_shapes=[pltpu.VMEM((tm_eff, D), jnp.float32)],
        )
        kernel = _mlp_streaming_kernel
        semantics = ("parallel", "arbitrary")

    out = pl.pallas_call(
        kernel,
        out_shape=jax.ShapeDtypeStruct((M, D), x.dtype),
        grid_spec=grid_spec,
        compiler_params=pltpu.CompilerParams(
            dimension_semantics=semantics,
            vmem_limit_bytes=vmem_limit,
        ),
        cost_estimate=cost,
    )(x2, w1, b1_2, w2, b2_2)

    return out.reshape(B, S, D)


def _ref_mlp(x, w1, b1, w2, b2):
    h = jnp.einsum("bsd,dh->bsh", x, w1) + b1
    h = 0.5 * h * (1.0 + jax.lax.erf(h / jnp.sqrt(2.0)))
    return jnp.einsum("bsh,hd->bsd", h, w2) + b2


if __name__ == "__main__":
    # Small shapes consistent with the module: encoder_size=32, hidden=4*32=128.
    B, S, D = 2, 8, 32
    H = 4 * D

    key = jax.random.PRNGKey(0)
    kx, kw1, kb1, kw2, kb2 = jax.random.split(key, 5)

    x = jax.random.normal(kx, (B, S, D), dtype=jnp.float32)

    # Deterministic init mimicking nn.Linear (uniform(-1/sqrt(fan_in), 1/sqrt(fan_in))).
    lim1 = 1.0 / math.sqrt(D)
    w1 = jax.random.uniform(kw1, (D, H), jnp.float32, -lim1, lim1)
    b1 = jax.random.uniform(kb1, (H,), jnp.float32, -lim1, lim1)
    lim2 = 1.0 / math.sqrt(H)
    w2 = jax.random.uniform(kw2, (H, D), jnp.float32, -lim2, lim2)
    b2 = jax.random.uniform(kb2, (D,), jnp.float32, -lim2, lim2)

    y = mlp_forward(x, w1, b1, w2, b2)
    y = jax.block_until_ready(y)

    y_ref = _ref_mlp(x, w1, b1, w2, b2)
    assert y.shape == (B, S, D)
    assert jnp.allclose(y, y_ref, atol=1e-5, rtol=1e-5), "mismatch vs reference"

    print("KERNEL_OK")
</pallas_src>

<mosaic_0001>
module attributes {stable_mosaic.version = 11 : i64} {
  func.func @_mlp_resident_kernel(%arg0: i32, %arg1: memref<16x32xf32, #tpu.memory_space<vmem>>, %arg2: memref<32x128xf32, #tpu.memory_space<vmem>>, %arg3: memref<1x128xf32, #tpu.memory_space<vmem>>, %arg4: memref<128x32xf32, #tpu.memory_space<vmem>>, %arg5: memref<1x32xf32, #tpu.memory_space<vmem>>, %arg6: memref<16x32xf32, #tpu.memory_space<vmem>>) attributes {dimension_semantics = [#tpu.dimension_semantics<parallel>], iteration_bounds = array<i64: 1>, scalar_prefetch = 0 : i64, scratch_operands = 0 : i64, tpu.core_type = #tpu.core_type<tc>, window_params = [{transform_indices = @transform_0, window_bounds = array<i64: 16, 32>}, {pipeline_mode = #tpu.pipeline_mode<synchronous>, transform_indices = @transform_1, window_bounds = array<i64: 32, 128>}, {pipeline_mode = #tpu.pipeline_mode<synchronous>, transform_indices = @transform_2, window_bounds = array<i64: 1, 128>}, {pipeline_mode = #tpu.pipeline_mode<synchronous>, transform_indices = @transform_3, window_bounds = array<i64: 128, 32>}, {pipeline_mode = #tpu.pipeline_mode<synchronous>, transform_indices = @transform_4, window_bounds = array<i64: 1, 32>}, {transform_indices = @transform_5, window_bounds = array<i64: 16, 32>}]} {
    %c0 = arith.constant 0 : index
    %c0_0 = arith.constant 0 : index
    %0 = vector.load %arg1[%c0, %c0_0] : memref<16x32xf32, #tpu.memory_space<vmem>>, vector<16x32xf32>
    %c0_1 = arith.constant 0 : index
    %c0_2 = arith.constant 0 : index
    %1 = vector.load %arg2[%c0_1, %c0_2] : memref<32x128xf32, #tpu.memory_space<vmem>>, vector<32x128xf32>
    %cst = arith.constant dense<0.000000e+00> : vector<16x128xf32>
    %2 = tpu.matmul %0, %1, %cst {dimension_numbers = #tpu.dot_dimension_numbers<[1], [0], [0], [1], [0, 0, 1, 1], [], []>} : vector<16x32xf32>, vector<32x128xf32>, vector<16x128xf32> -> vector<16x128xf32>
    %c0_3 = arith.constant 0 : index
    %c0_4 = arith.constant 0 : index
    %3 = vector.load %arg3[%c0_3, %c0_4] : memref<1x128xf32, #tpu.memory_space<vmem>>, vector<1x128xf32>
    %4 = vector.broadcast %3 : vector<1x128xf32> to vector<16x128xf32>
    %5 = arith.addf %2, %4 : vector<16x128xf32>
    %cst_5 = arith.constant 5.000000e-01 : f32
    %6 = vector.broadcast %cst_5 : f32 to vector<16x128xf32>
    %7 = arith.mulf %6, %5 : vector<16x128xf32>
    %cst_6 = arith.constant 0.707106769 : f32
    %8 = vector.broadcast %cst_6 : f32 to vector<16x128xf32>
    %9 = arith.mulf %5, %8 : vector<16x128xf32>
    %10 = math.erf %9 : vector<16x128xf32>
    %cst_7 = arith.constant 1.000000e+00 : f32
    %11 = vector.broadcast %cst_7 : f32 to vector<16x128xf32>
    %12 = arith.addf %11, %10 : vector<16x128xf32>
    %13 = arith.mulf %7, %12 : vector<16x128xf32>
    %c0_8 = arith.constant 0 : index
    %c0_9 = arith.constant 0 : index
    %14 = vector.load %arg4[%c0_8, %c0_9] : memref<128x32xf32, #tpu.memory_space<vmem>>, vector<128x32xf32>
    %cst_10 = arith.constant dense<0.000000e+00> : vector<16x32xf32>
    %15 = tpu.matmul %13, %14, %cst_10 {dimension_numbers = #tpu.dot_dimension_numbers<[1], [0], [0], [1], [0, 0, 1, 1], [], []>} : vector<16x128xf32>, vector<128x32xf32>, vector<16x32xf32> -> vector<16x32xf32>
    %c0_11 = arith.constant 0 : index
    %c0_12 = arith.constant 0 : index
    %16 = vector.load %arg5[%c0_11, %c0_12] : memref<1x32xf32, #tpu.memory_space<vmem>>, vector<1x32xf32>
    %17 = vector.broadcast %16 : vector<1x32xf32> to vector<16x32xf32>
    %18 = arith.addf %15, %17 : vector<16x32xf32>
    %c0_13 = arith.constant 0 : index
    %c0_14 = arith.constant 0 : index
    %19 = vector.load %arg6[%c0_13, %c0_14] : memref<16x32xf32, #tpu.memory_space<vmem>>, vector<16x32xf32>
    tpu.vector_store %arg6[%c0_13, %c0_14], %18 {strides = array<i32>} : memref<16x32xf32, #tpu.memory_space<vmem>>, vector<16x32xf32>,
    return
  }
  func.func @transform_0(%arg0: i32) -> (i32, i32) {
    %c0_i32 = arith.constant 0 : i32
    %c0_i32_0 = arith.constant 0 : i32
    return %arg0, %c0_i32 : i32, i32
  }
  func.func @transform_1(%arg0: i32) -> (i32, i32) {
    %c0_i32 = arith.constant 0 : i32
    %c0_i32_0 = arith.constant 0 : i32
    %c0_i32_1 = arith.constant 0 : i32
    return %c0_i32, %c0_i32_0 : i32, i32
  }
  func.func @transform_2(%arg0: i32) -> (i32, i32) {
    %c0_i32 = arith.constant 0 : i32
    %c0_i32_0 = arith.constant 0 : i32
    %c0_i32_1 = arith.constant 0 : i32
    return %c0_i32, %c0_i32_0 : i32, i32
  }
  func.func @transform_3(%arg0: i32) -> (i32, i32) {
    %c0_i32 = arith.constant 0 : i32
    %c0_i32_0 = arith.constant 0 : i32
    %c0_i32_1 = arith.constant 0 : i32
    return %c0_i32, %c0_i32_0 : i32, i32
  }
  func.func @transform_4(%arg0: i32) -> (i32, i32) {
    %c0_i32 = arith.constant 0 : i32
    %c0_i32_0 = arith.constant 0 : i32
    %c0_i32_1 = arith.constant 0 : i32
    return %c0_i32, %c0_i32_0 : i32, i32
  }
  func.func @transform_5(%arg0: i32) -> (i32, i32) {
    %c0_i32 = arith.constant 0 : i32
    %c0_i32_0 = arith.constant 0 : i32
    return %arg0, %c0_i32 : i32, i32
  }
}

</mosaic_0001>

<bundles_post_ra>
// kernel: tpu_custom_call.1
= control target key start
LH: loop header
LB: loop body
LE: loop exit
PB: predicated region body
PF: predicated region fallthrough
CT: control target
= control target key end

     0   :  { %vm34_vm0 = vcmask 261120   ;;  %s508_s0 = inlined_call_operand.vmem [shape: f32[16,32], index: 0, kind: input, shape index: {}]   ;;  %s509_s1 = inlined_call_operand.vmem [shape: f32[32,128], index: 1, kind: input, shape index: {}]   ;;  %s510_s2 = inlined_call_operand.vmem [shape: f32[1,128], index: 2, kind: input, shape index: {}]   ;;  %s511_s3 = inlined_call_operand.vmem [shape: f32[128,32], index: 3, kind: input, shape index: {}]   ;;  %s512_s4 = inlined_call_operand.vmem [shape: f32[1,32], index: 4, kind: input, shape index: {}]   ;;  %s513_s5 = inlined_call_operand.hbm [shape: f32[16,32], index: 5, kind: output, shape index: {}]  }
   0x1   :  { %v23_v0 = vld [vmem:[%s509_s1] sm:$0xff]  ;;  %v24_v1 = vld [vmem:[%s509_s1 + $0x8] sm:$0xff]  ;;  %v25_v2 = vld [vmem:[%s509_s1 + $0x10] sm:$0xff] }
   0x2   :  { %v316_v3 = vpack.c.bf16 %v24_v1, %v23_v0  ;;  %v26_v4 = vld [vmem:[%s509_s1 + $0x18] sm:$0xff]  ;;  %v21_v5 = vld [vmem:[%s508_s0] sm:$0xff]  ;;  %v127_v8 = vld [vmem:[%s511_s3 + $0x8] sm:$0xff] }
   0x3   :  { %v320_v6 = vpack.c.bf16 %v26_v4, %v25_v2  ;;  %278 = vmatprep.mubr.msk.f32.mxu0 %vm34_vm0, %v21_v5  ;;  %v126_v7 = vld [vmem:[%s511_s3] sm:$0xff]  ;;  %v128_v9 = vld [vmem:[%s511_s3 + $0x10] sm:$0xff]  ;;  %v129_v11 = vld [vmem:[%s511_s3 + $0x18] sm:$0xff] }
   0x4   :  { %317 = vmatprep.subr.bf16.mxu0 %v316_v3  ;;  %v324_v10 = vpack.c.bf16 %v127_v8, %v126_v7  ;;  %v328_v12 = vpack.c.bf16 %v129_v11, %v128_v9  ;;  %v130_v13 = vld [vmem:[%s511_s3 + $0x20] sm:$0xff]  ;;  %v131_v14 = vld [vmem:[%s511_s3 + $0x28] sm:$0xff] }
   0x5   :  { %319 = vmatpush3.bf16.msra.mxu0 %v316_v3 }
   0x6   :  { %10 = vsyncpa [#allocation3], 0  ;;  %321 = vmatprep.subr.bf16.mxu0 %v320_v6  ;;  %325 = vmatprep.subr.bf16.mxu1 %v324_v10  ;;  %v332_v15 = vpack.c.bf16 %v131_v14, %v130_v13  ;;  %v22_v16 = vld [vmem:[%s508_s0 + $0x8] sm:$0xff]  ;;  %v132_v17 = vld [vmem:[%s511_s3 + $0x30] sm:$0xff]  ;;  %s387_s11 = smov [#allocation2]  }
   0x7   :  { %327 = vmatpush3.bf16.msra.mxu1 %v324_v10  ;;  %v133_v18 = vld [vmem:[%s511_s3 + $0x38] sm:$0xff]  ;;  %v134_v20 = vld [vmem:[%s511_s3 + $0x40] sm:$0xff]  ;;  %v135_v21 = vld [vmem:[%s511_s3 + $0x48] sm:$0xff]  ;;  %s231_s12 = sshll.u32 %s387_s11, 4  ;;  %s232_s12 = int_to_ptr.vmem [resolvable:$true] %s231_s12 }
   0x8   :  { %329 = vmatprep.subr.bf16.mxu1 %v328_v12  ;;  %v336_v19 = vpack.c.bf16 %v133_v18, %v132_v17  ;;  %v340_v22 = vpack.c.bf16 %v135_v21, %v134_v20  ;;  %v136_v23 = vld [vmem:[%s511_s3 + $0x50] sm:$0xff]  ;;  %v137_v24 = vld [vmem:[%s511_s3 + $0x58] sm:$0xff]  ;;  %v138_v26 = vld [vmem:[%s511_s3 + $0x60] sm:$0xff]  ;;  %s363_s13 = scalar_lea.vmem %s232_s12, 256  ;;  %p368_p1 = scmp.lt.s32.totalorder %s232_s12, %s232_s12 }
   0x9   :  { %323 = vmatpush3.bf16.msra.mxu0 %v320_v6  ;;  %v344_v25 = vpack.c.bf16 %v137_v24, %v136_v23  ;;  %v139_v27 = vld [vmem:[%s511_s3 + $0x68] sm:$0xff]  ;;  %v140_v29 = vld [vmem:[%s511_s3 + $0x70] sm:$0xff]  ;;  %v141_v30 = vld [vmem:[%s511_s3 + $0x78] sm:$0xff]  ;;  %p364_p0 = scmp.ne.s32.totalorder %s232_s12, %s363_s13  ;;  %p369_p2 = scmp.lt.s32.totalorder %s363_s13, %s363_s13 }
   0xa   :  { %v348_v28 = vpack.c.bf16 %v139_v27, %v138_v26  ;;  %v352_v31 = vpack.c.bf16 %v141_v30, %v140_v29  ;;  %v242_v32 = vld [vmem:[%s510_s2] ss:$0 sm:$0xff] }
   0xb   :  { %331 = vmatpush3.bf16.msra.mxu1 %v328_v12  ;;  %v245_v47 = vld [vmem:[%s512_s4] ss:$0 sm:$0xff]  ;;  %p370_p3 = por %p369_p2, %p368_p1 }
   0xc   :  { %279 = vmatmul.mubr.msk.f32.vlgmr.msra.gmra.mrb[0].mxu0 %vm34_vm0, %v22_v16  ;;  %333 = vmatprep.subr.bf16.mxu1 %v332_v15 }
   0xd   :  { %p371_p4 = pnand %p370_p3, %p364_p0 }
   0xf   :  { %335 = vmatpush3.bf16.msra.mxu1 %v332_v15 }
  0x10   :  { %337 = vmatprep.subr.bf16.mxu1 %v336_v19 }
  0x13   :  { %339 = vmatpush3.bf16.msra.mxu1 %v336_v19 }
  0x14   :  { %341 = vmatprep.subr.bf16.mxu1 %v340_v22 }
  0x17   :  { %343 = vmatpush3.bf16.msra.mxu1 %v340_v22 }
  0x18   :  { %345 = vmatprep.subr.bf16.mxu1 %v344_v25 }
  0x1b   :  { %347 = vmatpush3.bf16.msra.mxu1 %v344_v25 }
  0x1c   :  { %349 = vmatprep.subr.bf16.mxu1 %v348_v28 }
  0x1f   :  { %351 = vmatpush3.bf16.msra.mxu1 %v348_v28 }
  0x20   :  { %353 = vmatprep.subr.bf16.mxu1 %v352_v31 }
  0x23   :  { %355 = vmatpush3.bf16.msra.mxu1 %v352_v31 }
  0xdf   :  { %v280_v33 = vpop.f32.mrb[0].mxu0 }
  0xe0   :  { %v113_v34 = vadd.f32 %v280_v33, %v242_v32  ;;  %v107_v35 = vpop.f32.mrb[1].mxu0 }
  0xe1   :  { %v108_v36 = vadd.f32 %v242_v32, %v107_v35 }
  0xe2   :  { %v119_v37 = vmul.f32 0.70710677, %v113_v34  ;;  %v117_v44 = vmul.f32 0.5, %v113_v34 }
  0xe3   :  { %v118_v38 = vmul.f32 0.70710677, %v108_v36  ;;  %v116_v42 = vmul.f32 0.5, %v108_v36 }
  0xe4   :  { %359 = verf.f32 %v119_v37 }
  0xe5   :  { %361 = verf.f32 %v118_v38 }
  0xee   :  { %v360_v39 = vpop.eup %359 }
  0xef   :  { %v362_v40 = vpop.eup %361  ;;  %v123_v41 = vadd.f32 1.0, %v360_v39 }
  0xf0   :  { %v122_v43 = vadd.f32 1.0, %v362_v40 }
  0xf1   :  { %v125_v46 = vmul.f32 %v123_v41, %v117_v44 }
  0xf2   :  { %v124_v45 = vmul.f32 %v122_v43, %v116_v42 }
  0xf4   :  { %313 = vmatprep.mubr.f32.mxu1 %v124_v45 }
  0xf5   :  { %314 = vmatmul.mubr.f32.vlgmr.msra.gmra.mrb[0].mxu1 %v125_v46 }
 0x1c8   :  { %v315_v48 = vpop.f32.mrb[0].mxu1 }
 0x1c9   :  { %v221_v49 = vadd.f32 %v315_v48, %v245_v47  ;;  %v215_v50 = vpop.f32.mrb[1].mxu1 }
 0x1ca   :  { %v216_v51 = vadd.f32 %v245_v47, %v215_v50 }
 0x1cb   :  { %225 = vst.msk [vmem:[#allocation2 + $0x8] sm:$0xff] %vm34_vm0, %v221_v49 }
 0x1cc   :  { %224 = vst.msk [vmem:[#allocation2] sm:$0xff] %vm34_vm0, %v216_v51 }
 0x1cd   :  { %374 = shalt.err (!%p371_p4)
}
 0x1ce   :  { %s375_s15 = scalar_lea.hbm %s513_s5, 256 }
 0x1cf   :  { %p376_p5 = scmp.ne.s32.totalorder %s513_s5, %s375_s15  ;;  %p379_p6 = scmp.lt.u32.totalorder %s375_s15, %s513_s5 }
 0x1d1   :  { %p381_p7 = pnand %p379_p6, %p376_p5 }
 0x1d3   :  { %384 = shalt.err (!%p381_p7)
}
 0x1d4   :  { %s388_s20 = smov 128   ;;  %s389_s21 = smov 8  }
 0x1d5   :  { %237 = dma.vmem_to_hbm [thread:$0]  %s232_s12, 256, %s513_s5, [#allocation3], %s388_s20, %s388_s20, %s389_s21  }
 0x1d6   :  { %385 = dma.done.wait [#allocation3], 256  }
 0x1d7   :  { %386 = vsyncadd [#allocation3], 4294967040 }
 0x1d8   :  { %241 = vsyncpa [#allocation3], 1 }

</bundles_post_ra>
